<compile_context>
chip_gen: v5e
topology: v5e:2x2
jax: 0.10.0
libtpu: 0.0.40
codegen_flags: <defaults>
</compile_context>

<pallas_src>
import jax
import jax.numpy as jnp
from jax.experimental import pallas as pl
from jax.experimental.pallas import tpu as pltpu


def _copy_kernel(x_ref, o_ref):
    # Pure VMEM copy of one (tile_rows, L) tile.
    o_ref[...] = x_ref[...]


# Sublane quantum per itemsize (f32 -> 8 rows, bf16 -> 16, int8/fp8 -> 32).
_SUBLANE = {4: 8, 2: 16, 1: 32}


def _pallas_copy_2d(x2d: jax.Array) -> jax.Array:
    """Tiled, auto-pipelined HBM->HBM copy of a 2-D array."""
    R, L = x2d.shape
    itemsize = jnp.dtype(x2d.dtype).itemsize
    sublane = _SUBLANE.get(itemsize, 8)

    # ~2 MiB per tile => <= ~8 MiB live with double-buffered input + output,
    # safe on v5e (16 MiB scoped default), v6e (32 MiB) and v7x (64 MiB phys).
    budget_bytes = 2 * 1024 * 1024
    max_rows = max(sublane, budget_bytes // max(1, L * itemsize))
    tile_r = min(1024, max_rows, R)
    tile_r = max(sublane, (tile_r // sublane) * sublane)
    if tile_r >= R:
        tile_r = R  # single full block (block dims == array dims is always legal)

    return pl.pallas_call(
        _copy_kernel,
        out_shape=jax.ShapeDtypeStruct((R, L), x2d.dtype),
        grid=(pl.cdiv(R, tile_r),),
        in_specs=[pl.BlockSpec((tile_r, L), lambda i: (i, 0))],
        out_specs=pl.BlockSpec((tile_r, L), lambda i: (i, 0)),
        compiler_params=pltpu.CompilerParams(
            dimension_semantics=("parallel",),
        ),
    )(x2d)


def flatten(x: jax.Array, use_pallas: bool = True) -> jax.Array:
    """Equivalent of Flatten.forward: (N, C, 1, 1) -> (N, C)."""
    assert x.ndim == 4 and x.shape[2] == 1 and x.shape[3] == 1, (
        f"expected (N, C, 1, 1), got {x.shape}"
    )
    N, C = x.shape[0], x.shape[1]

    # Recommended production path: squeezing trailing 1x1 dims of a dense
    # row-major tensor is a zero-cost metadata op -- no kernel needed.
    if not use_pallas:
        return jax.lax.squeeze(x, (2, 3))

    # --- Standalone Pallas kernel path (fusion-boundary stand-in) ---
    x2d = x.reshape(N, C)  # free metadata reshape
    total = N * C

    # Pick a lane-dense working view: last dim a multiple of 128 if possible
    # (avoids masked partial stores when C < 128 / not lane-aligned).
    work_shape = (N, C)
    if C % 128 != 0:
        for L in (1024, 512, 256, 128):
            if total % L == 0:
                work_shape = (total // L, L)
                break

    y = _pallas_copy_2d(x2d.reshape(work_shape))  # reshapes are free (dense)
    return y.reshape(N, C)


if __name__ == "__main__":
    key = jax.random.PRNGKey(0)

    # Shape consistent with the module's assert: (batch=2, channels=4, 1, 1).
    x_small = jax.random.normal(key, (2, 4, 1, 1), dtype=jnp.float32)
    out_small = jax.block_until_ready(flatten(x_small))
    ref_small = x_small[:, :, 0, 0]
    assert out_small.shape == (2, 4), out_small.shape
    assert out_small.dtype == x_small.dtype
    assert jnp.array_equal(out_small, ref_small), "mismatch vs reference (small)"

    # A lane-dense case (C multiple of 128) exercising the tiled copy path.
    x_big = jax.random.normal(key, (16, 256, 1, 1), dtype=jnp.float32)
    out_big = jax.block_until_ready(flatten(x_big))
    assert jnp.array_equal(out_big, x_big[:, :, 0, 0]), "mismatch vs reference (big)"

    # Zero-cost (no-kernel) path also matches.
    out_fast = jax.block_until_ready(flatten(x_small, use_pallas=False))
    assert jnp.array_equal(out_fast, ref_small), "mismatch vs reference (fast path)"

    print("KERNEL_OK")
</pallas_src>

<mosaic_0001>
module attributes {stable_mosaic.version = 11 : i64} {
  func.func @_copy_kernel(%arg0: i32, %arg1: memref<2x4xf32, #tpu.memory_space<vmem>>, %arg2: memref<2x4xf32, #tpu.memory_space<vmem>>) attributes {dimension_semantics = [#tpu.dimension_semantics<parallel>], iteration_bounds = array<i64: 1>, scalar_prefetch = 0 : i64, scratch_operands = 0 : i64, tpu.core_type = #tpu.core_type<tc>, window_params = [{transform_indices = @transform_0, window_bounds = array<i64: 2, 4>}, {transform_indices = @transform_1, window_bounds = array<i64: 2, 4>}]} {
    %c0 = arith.constant 0 : index
    %c0_0 = arith.constant 0 : index
    %0 = vector.load %arg1[%c0, %c0_0] : memref<2x4xf32, #tpu.memory_space<vmem>>, vector<2x4xf32>
    %c0_1 = arith.constant 0 : index
    %c0_2 = arith.constant 0 : index
    %1 = vector.load %arg2[%c0_1, %c0_2] : memref<2x4xf32, #tpu.memory_space<vmem>>, vector<2x4xf32>
    tpu.vector_store %arg2[%c0_1, %c0_2], %0 {strides = array<i32>} : memref<2x4xf32, #tpu.memory_space<vmem>>, vector<2x4xf32>,
    return
  }
  func.func @transform_0(%arg0: i32) -> (i32, i32) {
    %c0_i32 = arith.constant 0 : i32
    %c0_i32_0 = arith.constant 0 : i32
    return %arg0, %c0_i32 : i32, i32
  }
  func.func @transform_1(%arg0: i32) -> (i32, i32) {
    %c0_i32 = arith.constant 0 : i32
    %c0_i32_0 = arith.constant 0 : i32
    return %arg0, %c0_i32 : i32, i32
  }
}

</mosaic_0001>

<bundles_post_ra>
// kernel: tpu_custom_call.1
= control target key start
LH: loop header
LB: loop body
LE: loop exit
PB: predicated region body
PF: predicated region fallthrough
CT: control target
= control target key end

     0   :  { %6 = vsyncpa [#allocation3], 0  ;;  %s115_s0 = inlined_call_operand.hbm [shape: f32[2,4], index: 0, kind: input, shape index: {}]   ;;  %s116_s1 = inlined_call_operand.hbm [shape: f32[2,4], index: 1, kind: output, shape index: {}]  }
   0x1   :  { %7 = vsyncpa [#allocation4], 0  ;;  %s13_s8 = sshll.u32 %s115_s0, 4  ;;  %s97_s9 = smov [#allocation2]   ;;  %s14_s8 = int_to_ptr.hbm [resolvable:$true] %s13_s8 }
   0x2   :  { %s15_s10 = sshll.u32 %s97_s9, 4  ;;  %s16_s10 = int_to_ptr.vmem [resolvable:$true] %s15_s10 }
   0x3   :  { %18 = dma.hbm_to_vmem [thread:$0]  %s14_s8, 32, %s16_s10, [#allocation3]  }
   0x4   :  { %93 = dma.done.wait [#allocation3], 32  }
   0x5   :  { %94 = vsyncadd [#allocation3], 4294967264  ;;  %s98_s11 = smov [#allocation5]   ;;  %s33_s15 = sshll.u32 %s116_s1, 4  ;;  %vm24_vm0 = vcmask 25600   ;;  %s34_s15 = int_to_ptr.hbm [resolvable:$true] %s33_s15 }
   0x6   :  { %s31_s12 = sshll.u32 %s98_s11, 4  ;;  %v23_v0 = vld [vmem:[#allocation2] sm:$0x3]  ;;  %s32_s12 = int_to_ptr.vmem [resolvable:$true] %s31_s12 }
   0x7   :  { %25 = vst.msk [vmem:[#allocation5] sm:$0x3] %vm24_vm0, %v23_v0 }
   0x8   :  { %36 = dma.vmem_to_hbm [thread:$0]  %s32_s12, 32, %s34_s15, [#allocation4]  }
   0x9   :  { %95 = dma.done.wait [#allocation4], 32  }
   0xa   :  { %96 = vsyncadd [#allocation4], 4294967264 }
   0xb   :  { %41 = vsyncpa [#allocation3], 1 }
   0xc   :  { %42 = vsyncpa [#allocation4], 1 }

</bundles_post_ra>
